<compile_context>
chip_gen: v7x
topology: tpu7x:2x2x1
jax: 0.10.0
libtpu: 0.0.40
codegen_flags: <defaults>
</compile_context>

<pallas_src>
import functools

import jax
import jax.numpy as jnp
import numpy as np
from jax.experimental import pallas as pl
from jax.experimental.pallas import tpu as pltpu


# --------------------------------------------------------------------------------------
# Kernel 1: fused K / V projection.  One token tile per grid step; K stored transposed.
# --------------------------------------------------------------------------------------
def kv_proj_kernel(x_ref, wkv_ref, bkv_ref, kT_ref, v_ref, *, cqp, compute_dtype):
    """x_ref: (1, TP, Cp);  wkv_ref: (Cp, Cqp+Cp);  kT_ref: (1, Cqp, TP);  v_ref: (1, TP, Cp)."""
    x = x_ref[0].astype(compute_dtype)                                        # (TP, Cp)
    kv = jnp.dot(x, wkv_ref[...], preferred_element_type=jnp.float32) + bkv_ref[...]
    # K transposed once per token (amortized over every query tile); transpose in f32
    # (native vxpose path) then cast.
    kT_ref[0] = kv[:, :cqp].T.astype(compute_dtype)                           # (Cqp, TP)
    v_ref[0] = kv[:, cqp:].astype(compute_dtype)                              # (TP, Cp)


# --------------------------------------------------------------------------------------
# Kernel 2: flash-style attention over (batch, q-tile, kv-tile).
# --------------------------------------------------------------------------------------
def attn_kernel(x_ref, wq_ref, bq_ref, kT_ref, v_ref, gamma_ref, o_ref,
                q_scr, m_scr, l_scr, acc_scr, *, exp_dtype, compute_dtype):
    """x_ref: (1, TQ, Cp);  wq_ref: (Cp, Cqp);  kT_ref: (1, Cqp, TKV);  v_ref: (1, TKV, Cp)."""
    kv = pl.program_id(2)

    @pl.when(kv == 0)
    def _():
        # Q projection once per (batch, q-tile); softmax statistics / accumulator init.
        xq = x_ref[0].astype(compute_dtype)
        q = jnp.dot(xq, wq_ref[...], preferred_element_type=jnp.float32) + bq_ref[...]
        q_scr[...] = q.astype(compute_dtype)
        m_scr[...] = jnp.full_like(m_scr, -jnp.inf)
        l_scr[...] = jnp.zeros_like(l_scr)
        acc_scr[...] = jnp.zeros_like(acc_scr)

    # energy[i, j] = q[i, :] . k[j, :]   (K already transposed -> canonical MXU matmul)
    energy = jnp.dot(q_scr[...], kT_ref[0], preferred_element_type=jnp.float32)  # (TQ, TKV)

    m_prev = m_scr[...]
    m_new = jnp.maximum(m_prev, jnp.max(energy, axis=-1, keepdims=True))         # (TQ, 1) f32
    alpha = jnp.exp(m_prev - m_new)                                               # (TQ, 1) f32
    # Exponent in compute dtype by default (bf16 EUP on v6e/v7x); stats stay f32.
    p = jnp.exp((energy - m_new).astype(exp_dtype))                               # (TQ, TKV)

    l_scr[...] = alpha * l_scr[...] + jnp.sum(p, axis=-1, keepdims=True,
                                              dtype=jnp.float32)
    acc_scr[...] = alpha * acc_scr[...] + jnp.dot(
        p.astype(compute_dtype), v_ref[0], preferred_element_type=jnp.float32)
    m_scr[...] = m_new

    @pl.when(kv == pl.num_programs(2) - 1)
    def _():
        l = l_scr[...]
        r = pl.reciprocal(l, approx=True)        # EUP slot (essentially free)
        r = r * (2.0 - l * r)                    # Newton step 1
        r = r * (2.0 - l * r)                    # Newton step 2 -> ~f32-exact 1/l
        gamma = gamma_ref[0, 0]                  # scalar from SMEM
        out = gamma * (acc_scr[...] * r) + x_ref[0].astype(jnp.float32)
        o_ref[0] = out.astype(o_ref.dtype)


# --------------------------------------------------------------------------------------
# Tiling helpers.
# --------------------------------------------------------------------------------------
def _round_up(x, m):
    return ((x + m - 1) // m) * m


def _pick_row_tile(n, target):
    """Divisor of n <= target for dims appearing as a block's second-to-last axis.
    Prefers MXU-friendly multiples of 256, then 128, then 8; falls back to n."""
    if n <= target:
        return n
    for base in (256, 128, 8):
        best, t = 0, base
        while t <= target:
            if n % t == 0:
                best = t
            t += base
        if best:
            return best
    return n


def _pick_lane_tile(n, target):
    """Divisor of n <= target for dims appearing as a block's LAST axis (must be a
    multiple of 128 or the full dim)."""
    if n <= target:
        return n
    best, t = 0, 128
    while t <= target:
        if n % t == 0:
            best = t
        t += 128
    return best if best else n


def _hw_defaults():
    """Generation-aware tile / VMEM-limit defaults (conservative fallback if query fails)."""
    try:
        vmem = int(pltpu.get_tpu_info().vmem_capacity_bytes)
    except Exception:
        vmem = 64 * 1024 * 1024
    if vmem <= 64 * 1024 * 1024:   # v7x-class TensorCore (64 MiB VMEM)
        return dict(q_tile=256, kv_tile=512, proj_tile=256,
                    vmem_limit=48 * 1024 * 1024)
    return dict(q_tile=512, kv_tile=1024, proj_tile=512,      # v5e / v6e (128 MiB VMEM)
                vmem_limit=100 * 1024 * 1024)


# --------------------------------------------------------------------------------------
# Wrapper.
# --------------------------------------------------------------------------------------
def self_attn(x_nchw, wq, bq, wk, bk, wv, bv, gamma, *,
              q_tile=None, kv_tile=None, proj_tile=None,
              compute_dtype=jnp.bfloat16, exp_dtype=None):
    """SAGAN self-attention forward.

    x_nchw: (B, C, H, W).  wq/wk: (C, C//8), wv: (C, C), biases are (1, out_ch) rows,
    gamma is a single-element array.  compute_dtype is the MXU input dtype (bf16
    recommended on v6e/v7x; float32 for near-bit-exact checks); accumulation is always
    f32.  exp_dtype defaults to compute_dtype (pass jnp.float32 on v5e: no bf16 EUP).
    """
    B, C, H, W = x_nchw.shape
    N = H * W
    Cq = wq.shape[1]

    defaults = _hw_defaults()
    q_tile = defaults["q_tile"] if q_tile is None else q_tile
    kv_tile = defaults["kv_tile"] if kv_tile is None else kv_tile
    proj_tile = defaults["proj_tile"] if proj_tile is None else proj_tile
    vmem_limit = defaults["vmem_limit"]
    exp_dtype = compute_dtype if exp_dtype is None else exp_dtype

    # Lane-dense channel padding (avoids masked vst for C < 128).  Padded V columns have
    # zero weights + zero bias and the padded residual is zero, so padded outputs are
    # exactly zero and are sliced off below.
    Cp = C if C >= 128 else 128
    cpad = Cp - C
    # Pad the tiny q/k projection width (C//8) to an MXU-native 128-lane contraction
    # (padded q/k columns are exactly zero, so energies are unchanged).
    Cqp = _round_up(Cq, 128)

    wq_p = jnp.pad(wq, ((0, cpad), (0, Cqp - Cq)))
    bq_p = jnp.pad(bq, ((0, 0), (0, Cqp - Cq)))
    wk_p = jnp.pad(wk, ((0, cpad), (0, Cqp - Cq)))
    bk_p = jnp.pad(bk, ((0, 0), (0, Cqp - Cq)))
    wv_p = jnp.pad(wv, ((0, cpad), (0, cpad)))
    bv_p = jnp.pad(bv, ((0, 0), (0, cpad)))

    # Fused K|V projection weight (one MXU pass per token tile), pre-cast to the MXU
    # input dtype so no per-tile weight casts happen inside the kernels.
    w_kv = jnp.concatenate([wk_p, wv_p], axis=1).astype(compute_dtype)      # (Cp, Cqp+Cp)
    b_kv = jnp.concatenate([bk_p, bv_p], axis=1).astype(jnp.float32)        # (1, Cqp+Cp)
    wq_c = wq_p.astype(compute_dtype)                                       # (Cp, Cqp)
    bq_c = bq_p.astype(jnp.float32)                                         # (1, Cqp)
    gamma2 = jnp.reshape(gamma, (1, 1)).astype(jnp.float32)

    # NCHW -> (B, N, Cp), token index n = h*W + w (matches torch .view flattening).
    x_bnc = jnp.transpose(x_nchw, (0, 2, 3, 1)).reshape(B, N, C)
    if cpad:
        x_bnc = jnp.pad(x_bnc, ((0, 0), (0, 0), (0, cpad)))

    TQ = _pick_row_tile(N, q_tile)
    TKV = _pick_lane_tile(N, kv_tile)
    TP = _pick_lane_tile(N, proj_tile)
    nq, nkv, nt = N // TQ, N // TKV, N // TP

    # ---------------- pass 1: K^T and V projections (per token tile) ----------------
    kT, v = pl.pallas_call(
        functools.partial(kv_proj_kernel, cqp=Cqp, compute_dtype=compute_dtype),
        out_shape=(jax.ShapeDtypeStruct((B, Cqp, N), compute_dtype),
                   jax.ShapeDtypeStruct((B, N, Cp), compute_dtype)),
        grid_spec=pltpu.PrefetchScalarGridSpec(
            num_scalar_prefetch=0,
            grid=(B, nt),
            in_specs=[
                pl.BlockSpec((1, TP, Cp), lambda b, t: (b, t, 0)),          # x tile
                pl.BlockSpec((Cp, Cqp + Cp), lambda b, t: (0, 0)),          # Wk|Wv (pre-cast)
                pl.BlockSpec((1, Cqp + Cp), lambda b, t: (0, 0)),           # bk|bv
            ],
            out_specs=[
                pl.BlockSpec((1, Cqp, TP), lambda b, t: (b, 0, t)),         # K^T
                pl.BlockSpec((1, TP, Cp), lambda b, t: (b, t, 0)),          # V
            ],
        ),
        compiler_params=pltpu.CompilerParams(
            dimension_semantics=("parallel", "parallel"),
            vmem_limit_bytes=vmem_limit,
        ),
    )(x_bnc, w_kv, b_kv)

    # ---------------- pass 2: flash attention + Q projection + residual ----------------
    out_bnc = pl.pallas_call(
        functools.partial(attn_kernel, exp_dtype=exp_dtype, compute_dtype=compute_dtype),
        out_shape=jax.ShapeDtypeStruct((B, N, Cp), x_bnc.dtype),
        grid_spec=pltpu.PrefetchScalarGridSpec(
            num_scalar_prefetch=0,
            grid=(B, nq, nkv),
            in_specs=[
                pl.BlockSpec((1, TQ, Cp), lambda b, q, k: (b, q, 0)),       # x tile (Q + residual)
                pl.BlockSpec((Cp, Cqp), lambda b, q, k: (0, 0)),            # Wq (pre-cast)
                pl.BlockSpec((1, Cqp), lambda b, q, k: (0, 0)),             # bq
                pl.BlockSpec((1, Cqp, TKV), lambda b, q, k: (b, 0, k)),     # K^T chunk
                pl.BlockSpec((1, TKV, Cp), lambda b, q, k: (b, k, 0)),      # V chunk
                pl.BlockSpec(memory_space=pltpu.MemorySpace.SMEM),          # gamma (scalar)
            ],
            out_specs=pl.BlockSpec((1, TQ, Cp), lambda b, q, k: (b, q, 0)),
            scratch_shapes=[
                pltpu.VMEM((TQ, Cqp), compute_dtype),   # Q tile (projected once per q-tile)
                pltpu.VMEM((TQ, 1), jnp.float32),       # running max
                pltpu.VMEM((TQ, 1), jnp.float32),       # running denominator
                pltpu.VMEM((TQ, Cp), jnp.float32),      # output accumulator
            ],
        ),
        compiler_params=pltpu.CompilerParams(
            # No cross-q-tile scratch carry anymore -> batch AND q-tile axes are parallel
            # (both v7x TensorCores usable even at B == 1); KV axis is the reduction.
            dimension_semantics=("parallel", "parallel", "arbitrary"),
            vmem_limit_bytes=vmem_limit,
        ),
    )(x_bnc, wq_c, bq_c, kT, v, gamma2)

    if cpad:
        out_bnc = out_bnc[:, :, :C]
    return jnp.transpose(out_bnc.reshape(B, H, W, C), (0, 3, 1, 2))


# --------------------------------------------------------------------------------------
# Pure-JAX reference mirroring the PyTorch forward exactly (f32 throughout).
# --------------------------------------------------------------------------------------
def self_attn_ref(x_nchw, wq, bq, wk, bk, wv, bv, gamma):
    B, C, H, W = x_nchw.shape
    N = H * W
    x_bcn = x_nchw.reshape(B, C, N)
    # 1x1 conv: out[b, o, n] = sum_c W[c, o] * x[b, c, n] + b[o]
    q = jnp.einsum('bcn,co->bon', x_bcn, wq) + bq[0][None, :, None]   # (B, Cq, N)
    k = jnp.einsum('bcn,co->bon', x_bcn, wk) + bk[0][None, :, None]   # (B, Cq, N)
    v = jnp.einsum('bcn,co->bon', x_bcn, wv) + bv[0][None, :, None]   # (B, C, N)
    proj_q = jnp.transpose(q, (0, 2, 1))                              # (B, N, Cq)
    energy = jnp.einsum('bnc,bcm->bnm', proj_q, k)                    # (B, N, N)
    att = jax.nn.softmax(energy, axis=-1)
    out = jnp.einsum('bcn,bmn->bcm', v, att)                          # (B, C, N)
    out = out.reshape(B, C, H, W)
    return gamma.reshape(()) * out + x_nchw


if __name__ == "__main__":
    B, C, H, W = 2, 16, 16, 16   # C divisible by 8; N = 256 so multi-tile grids are exercised
    Cq = C // 8

    key = jax.random.PRNGKey(0)
    kx, kq, kk, kv_, kbq, kbk, kbv = jax.random.split(key, 7)

    x = jax.random.normal(kx, (B, C, H, W), dtype=jnp.float32)

    scale = 1.0 / np.sqrt(C)
    wq = jax.random.normal(kq, (C, Cq), dtype=jnp.float32) * scale
    wk = jax.random.normal(kk, (C, Cq), dtype=jnp.float32) * scale
    wv = jax.random.normal(kv_, (C, C), dtype=jnp.float32) * scale
    bq = jax.random.normal(kbq, (1, Cq), dtype=jnp.float32) * scale
    bk = jax.random.normal(kbk, (1, Cq), dtype=jnp.float32) * scale
    bv = jax.random.normal(kbv, (1, C), dtype=jnp.float32) * scale
    # gamma is zeros in the module; set nonzero so the attention path is exercised.
    gamma = jnp.full((1, 1), 0.5, dtype=jnp.float32)

    ref = self_attn_ref(x, wq, bq, wk, bk, wv, bv, gamma)

    # 1) f32 MXU-input path with small tiles: exercises the multi-q-tile grid, the
    #    multi-chunk online softmax (nkv=2) and both pl.when phases; tight tolerance.
    out_f32 = self_attn(x, wq, bq, wk, bk, wv, bv, gamma,
                        q_tile=64, kv_tile=128, proj_tile=128,
                        compute_dtype=jnp.float32)
    jax.block_until_ready(out_f32)
    np.testing.assert_allclose(np.asarray(out_f32), np.asarray(ref), rtol=1e-4, atol=1e-4)

    # 2) Default path (bf16 MXU inputs + bf16 exponent, f32 accumulation/statistics);
    #    loose sanity tolerance against the pure-f32 reference.
    out_bf16 = self_attn(x, wq, bq, wk, bk, wv, bv, gamma)
    jax.block_until_ready(out_bf16)
    np.testing.assert_allclose(np.asarray(out_bf16), np.asarray(ref), rtol=1e-1, atol=1e-1)

    print("KERNEL_OK")
</pallas_src>

<mosaic_0001>
module attributes {stable_mosaic.version = 11 : i64} {
  func.func @kv_proj_kernel(%arg0: i32, %arg1: i32, %arg2: memref<1x128x128xf32, #tpu.memory_space<vmem>>, %arg3: memref<128x256xf32, #tpu.memory_space<vmem>>, %arg4: memref<1x256xf32, #tpu.memory_space<vmem>>, %arg5: memref<1x128x128xf32, #tpu.memory_space<vmem>>, %arg6: memref<1x128x128xf32, #tpu.memory_space<vmem>>) attributes {dimension_semantics = [#tpu.dimension_semantics<parallel>, #tpu.dimension_semantics<parallel>], iteration_bounds = array<i64: 2, 2>, scalar_prefetch = 0 : i64, scratch_operands = 0 : i64, tpu.core_type = #tpu.core_type<tc>, window_params = [{transform_indices = @transform_0, window_bounds = array<i64: 1, 128, 128>}, {pipeline_mode = #tpu.pipeline_mode<synchronous>, transform_indices = @transform_1, window_bounds = array<i64: 128, 256>}, {pipeline_mode = #tpu.pipeline_mode<synchronous>, transform_indices = @transform_2, window_bounds = array<i64: 1, 256>}, {transform_indices = @transform_3, window_bounds = array<i64: 1, 128, 128>}, {transform_indices = @transform_4, window_bounds = array<i64: 1, 128, 128>}]} {
    %c0 = arith.constant 0 : index
    %c0_0 = arith.constant 0 : index
    %c0_1 = arith.constant 0 : index
    %0 = vector.load %arg2[%c0, %c0_0, %c0_1] : memref<1x128x128xf32, #tpu.memory_space<vmem>>, vector<1x128x128xf32>
    %1 = vector.shape_cast %0 : vector<1x128x128xf32> to vector<128x128xf32>
    %c0_2 = arith.constant 0 : index
    %c0_3 = arith.constant 0 : index
    %2 = vector.load %arg3[%c0_2, %c0_3] : memref<128x256xf32, #tpu.memory_space<vmem>>, vector<128x256xf32>
    %cst = arith.constant dense<0.000000e+00> : vector<128x256xf32>
    %3 = tpu.matmul %1, %2, %cst {dimension_numbers = #tpu.dot_dimension_numbers<[1], [0], [0], [1], [0, 0, 1, 1], [], []>} : vector<128x128xf32>, vector<128x256xf32>, vector<128x256xf32> -> vector<128x256xf32>
    %c0_4 = arith.constant 0 : index
    %c0_5 = arith.constant 0 : index
    %4 = vector.load %arg4[%c0_4, %c0_5] : memref<1x256xf32, #tpu.memory_space<vmem>>, vector<1x256xf32>
    %5 = vector.broadcast %4 : vector<1x256xf32> to vector<128x256xf32>
    %6 = arith.addf %3, %5 : vector<128x256xf32>
    %7 = vector.extract_strided_slice %6 {offsets = [0, 0], sizes = [128, 128], strides = [1, 1]} : vector<128x256xf32> to vector<128x128xf32>
    %8 = tpu.transpose %7, [1, 0] : vector<128x128xf32> -> vector<128x128xf32>
    %c0_6 = arith.constant 0 : index
    %c0_7 = arith.constant 0 : index
    %c0_8 = arith.constant 0 : index
    %9 = vector.load %arg5[%c0_6, %c0_7, %c0_8] : memref<1x128x128xf32, #tpu.memory_space<vmem>>, vector<1x128x128xf32>
    %10 = vector.shape_cast %9 : vector<1x128x128xf32> to vector<128x128xf32>
    %11 = vector.shape_cast %8 : vector<128x128xf32> to vector<1x128x128xf32>
    tpu.vector_store %arg5[%c0_6, %c0_7, %c0_8], %11 {strides = array<i32>} : memref<1x128x128xf32, #tpu.memory_space<vmem>>, vector<1x128x128xf32>,
    %12 = vector.extract_strided_slice %6 {offsets = [0, 128], sizes = [128, 128], strides = [1, 1]} : vector<128x256xf32> to vector<128x128xf32>
    %c0_9 = arith.constant 0 : index
    %c0_10 = arith.constant 0 : index
    %c0_11 = arith.constant 0 : index
    %13 = vector.load %arg6[%c0_9, %c0_10, %c0_11] : memref<1x128x128xf32, #tpu.memory_space<vmem>>, vector<1x128x128xf32>
    %14 = vector.shape_cast %13 : vector<1x128x128xf32> to vector<128x128xf32>
    %15 = vector.shape_cast %12 : vector<128x128xf32> to vector<1x128x128xf32>
    tpu.vector_store %arg6[%c0_9, %c0_10, %c0_11], %15 {strides = array<i32>} : memref<1x128x128xf32, #tpu.memory_space<vmem>>, vector<1x128x128xf32>,
    return
  }
  func.func @transform_0(%arg0: i32, %arg1: i32) -> (i32, i32, i32) {
    %c0_i32 = arith.constant 0 : i32
    %c0_i32_0 = arith.constant 0 : i32
    return %arg0, %arg1, %c0_i32 : i32, i32, i32
  }
  func.func @transform_1(%arg0: i32, %arg1: i32) -> (i32, i32) {
    %c0_i32 = arith.constant 0 : i32
    %c0_i32_0 = arith.constant 0 : i32
    %c0_i32_1 = arith.constant 0 : i32
    return %c0_i32, %c0_i32_0 : i32, i32
  }
  func.func @transform_2(%arg0: i32, %arg1: i32) -> (i32, i32) {
    %c0_i32 = arith.constant 0 : i32
    %c0_i32_0 = arith.constant 0 : i32
    %c0_i32_1 = arith.constant 0 : i32
    return %c0_i32, %c0_i32_0 : i32, i32
  }
  func.func @transform_3(%arg0: i32, %arg1: i32) -> (i32, i32, i32) {
    %c0_i32 = arith.constant 0 : i32
    %c0_i32_0 = arith.constant 0 : i32
    return %arg0, %c0_i32, %arg1 : i32, i32, i32
  }
  func.func @transform_4(%arg0: i32, %arg1: i32) -> (i32, i32, i32) {
    %c0_i32 = arith.constant 0 : i32
    %c0_i32_0 = arith.constant 0 : i32
    return %arg0, %arg1, %c0_i32 : i32, i32, i32
  }
}

</mosaic_0001>

<bundles_post_ra>
// kernel: tpu_custom_call.1
= control target key start
LH: loop header
LB: loop body
LE: loop exit
PB: predicated region body
PF: predicated region fallthrough
CT: control target
= control target key end

     0   :  { %s1531_s0 = inlined_call_operand.hbm [shape: f32[2,256,128], index: 0, kind: input, shape index: {}]   ;;  %s1532_s1 = inlined_call_operand.hbm [shape: f32[128,256], index: 1, kind: input, shape index: {}]   ;;  %s1533_s2 = inlined_call_operand.vmem [shape: f32[1,256], index: 2, kind: input, shape index: {}]   ;;  %s1534_s3 = inlined_call_operand.hbm [shape: f32[2,128,256], index: 3, kind: output, shape index: {0}]   ;;  %s1535_s4 = inlined_call_operand.hbm [shape: f32[2,256,128], index: 4, kind: output, shape index: {1}]  }
   0x1   :  { %1545 = sst [smem:[#allocation19_spill]] %s1532_s1 }
   0x2   :  { %10 = vsyncpa [#allocation3], 0 }
   0x3   :  { %12 = vsyncpa [#allocation3 + $0x1], 0 }
   0x4   :  { %13 = vsyncpa [#allocation6], 0 }
   0x5   :  { %14 = vsyncpa [#allocation4], 0 }
   0x6   :  { %16 = vsyncpa [#allocation4 + $0x1], 0 }
   0x7   :  { %17 = vsyncpa [#allocation9], 0 }
   0x8   :  { %19 = vsyncpa [#allocation9 + $0x1], 0  ;;  %s1125_s15 = smov 0   ;;  %s1127_s16 = smov 0  }
   0x9   :  { %s1129_s17 = smov 0   ;;  %s1131_s18 = smov 0  }
   0xa   :  { %s1133_s19 = smov 0   ;;  %s1135_s20 = smov 0  }
   0xb   :  { %s1137_s21 = smov 0   ;;  %s1139_s22 = smov 0  }
   0xc LB: > { %1546 = sst [smem:[#allocation14_spill]] %s1058_s15  ;;  %s721_s23 = sadd.s32 4294967295, %s1086_s22   ;;  %s1086_s22 = sphi %s1139_s22, %s25_s22   ;;  %s1082_s21 = sphi %s1137_s21, %s1575_s21   ;;  %s1078_s20 = sphi %s1135_s20, %s1569_s20   ;;  %s1074_s19 = sphi %s1133_s19, %s1574_s19   ;;  %s1070_s18 = sphi %s1131_s18, %s1568_s18   ;;  %s1066_s17 = sphi %s1129_s17, %s1573_s17   ;;  %s1062_s16 = sphi %s1127_s16, %s1572_s16   ;;  %s1058_s15 = sphi %s1125_s15, %s1571_s15  }
   0xd   : > { %1547 = sst [smem:[#allocation15_spill]] %s1078_s20  ;;  %s722_s24 = sadd.s32 4294967294, %s1086_s22  }
   0xe   : > { %p59_p0 = scmp.ne.s32.totalorder %s1062_s16, %s1058_s15  ;;  %p1169_p1 = scmp.eq.s32.totalorder %s721_s23, 0 }
   0xf   : > { %p1173_p2 = scmp.eq.s32.totalorder %s721_s23, 3  ;;  %p133_p3 = scmp.eq.s32.totalorder %s722_s24, 3 }
  0x10   : > { %s1548_s25 = scalar_select %p1169_p1, 1, 0 }
  0x11   : > { %s1549_s26 = scalar_select %p1173_p2, 1, 0 }
  0x12   : > { %p1179_p4 = por %p1169_p1, %p59_p0  ;;  %p723_p5 = scmp.ge.s32.totalorder %s1086_s22, 1 }
  0x13   : > { %p1184_p6 = por %p133_p3, %p59_p0  ;;  %p168_p7 = scmp.lt.s32.totalorder %s1086_s22, 5 }
  0x14   : > { %s1550_s27 = scalar_select %p1179_p4, 1, 0 }
  0x15   : > { %s1551_s28 = scalar_select %p1184_p6, 1, 0 }
  0x16   : > { %p1189_p8 = pnand %p723_p5, %p168_p7  ;;  %s1088_s30 = smov [#allocation5]  }
  0x17   : > { %1552 = sst [smem:[#allocation16_spill]] %s1551_s28  ;;  %s180_s5 = sshll.u32 %s1088_s30, 4  ;;  %s181_s5 = int_to_ptr.vmem [resolvable:$true] %s180_s5 }
  0x18   : > { %s1553_s29 = scalar_select %p1189_p8, 1, 0 }
  0x19   : > { %p802_p9 = pneg %p1189_p8  ;;  %s1555_s1 = sld [smem:[#allocation19_spill]] }
  0x1b   : > { %p1197_p10 = pnand %p802_p9, %p1169_p1 }
  0x1d   : > { %p896_p12 = pneg %p1197_p10 }
  0x1f   : > { %s894_s9 = scalar_lea.hbm %s1555_s1, 4096 }
  0x20   : > { %p895_p11 = scmp.ne.s32.totalorder %s1555_s1, %s894_s9  ;;  %p901_p3 = scmp.lt.u32.totalorder %s894_s9, %s1555_s1 }
  0x22   : > { %p897_p13 = pnand %p896_p12, %p895_p11 }
  0x24   : > { %p898_p0 = pneg %p897_p13 }
  0x26   : > { %p903_p5 = pnand %p901_p3, %p898_p0 }
  0x28   : > { %906 = shalt.err (!%p903_p5)
}
  0x29   : > { %s907_s14 = scalar_lea.vmem %s181_s5, 4096  ;;  %p915_p1 = scmp.lt.s32.totalorder %s181_s5, %s181_s5 }
  0x2a   : > { %p908_p7 = scmp.ne.s32.totalorder %s181_s5, %s907_s14  ;;  %p916_p4 = scmp.lt.s32.totalorder %s907_s14, %s907_s14 }
  0x2c   : > { %p910_p9 = pnand %p908_p7, %p896_p12  ;;  %p917_p8 = por %p916_p4, %p915_p1 }
  0x2e   : > { %p911_p6 = pneg %p910_p9 }
  0x30   : > { %p918_p2 = pnand %p917_p8, %p911_p6 }
  0x32   : > { %921 = shalt.err (!%p918_p2)
}
  0x33   : > { %s1089_s23 = smov 256   ;;  %s1090_s24 = smov 16  }
  0x34   : > { %805 = dma.hbm_to_vmem [thread:$0]  (!%p1197_p10), %s1555_s1, 4096, %s181_s5, [#allocation6], %s1089_s23, %s1089_s23, %s1090_s24  }
  0x35   : > { %s34_s8 = sadd.s32 1, %s1078_s20  ;;  %s37_s9 = sadd.s32 1, %s1082_s21 }
  0x36   : > { %p35_p1 = scmp.ge.s32.totalorder %s34_s8, 2  ;;  %s46_s10 = sadd.s32 1, %s1066_s17 }
  0x37   : > { %p53_p2 = scmp.ne.s32.totalorder %s1066_s17, %s1062_s16  ;;  %p54_p4 = scmp.eq.s32.totalorder %s1086_s22, 0 }
  0x38   : > { %s1577_s8 = smov (%p35_p1, %s34_s8), 0  ;;  %s1579_s9 = smov (!%p35_p1, %s37_s9), %s1082_s21 }
  0x39   : > { %1556 = sst [smem:[#allocation17_spill]] %s1577_s8  ;;  %s42_s11 = ssub.s32 %s1078_s20, %s1577_s8 }
  0x3a   : > { %p39_p6 = scmp.ge.s32.totalorder %s1579_s9, 2  ;;  %p1557_p8 = scmp.ne.s32.totalorder %s1549_s26, 0 }
  0x3b   : > { %p1234_p10 = por %p54_p4, %p53_p2  ;;  %p818_p12 = scmp.lt.s32.totalorder %s1086_s22, 4 }
  0x3c   : > { %p1230_p11 = por %p1557_p8, %p53_p2  ;;  %s1581_s9 = smov (%p39_p6, %s1579_s9), 0 }
  0x3d   : > { %1560 = sst [smem:[#allocation18_spill]] %s1581_s9  ;;  %s197_s12 = sand.u32 1, %s1066_s17  }
  0x3e   : > { %s727_s13 = sshll.u32 %s1078_s20, 4  ;;  %s41_s14 = ssub.s32 %s1082_s21, %s1581_s9 }
  0x3f   : > { %s43_s23 = sor.u32 %s42_s11, %s41_s14  ;;  %s726_s24 = sshll.u32 %s197_s12, 7 }
  0x40   : > { %p44_p13 = scmp.eq.s32.totalorder %s43_s23, 0  ;;  %s728_s26 = sshll.u32 %s1082_s21, 5 }
  0x41   : > { %s201_s30 = scalar_lea.vmem [#allocation2], %s726_s24  ;;  %s207_s8 = sadd.s32 %s728_s26, %s727_s13 }
  0x42   : > { %s210_s7 = sshll.u32 %s201_s30, 4  ;;  %s729_s28 = sshll.u32 %s207_s8, 7  ;;  %s1249_s7 = int_to_ptr.vmem [resolvable:$true] %s210_s7 }
  0x43   : > { %s1247_s1 = scalar_select %p44_p13, %s1066_s17, %s46_s10  }
  0x44   : > { %p1255_p0 = pnand %p818_p12, %p1234_p10  ;;  %s1262_s11 = scalar_lea.hbm %s1531_s0, %s729_s28 }
  0x45   : > { %s1264_s10 = scalar_lea.sflag [#allocation3], %s197_s12  ;;  %s922_s8 = scalar_lea.hbm %s1262_s11, 2048 }
  0x46   : > { %p923_p3 = scmp.ne.s32.totalorder %s1262_s11, %s922_s8  ;;  %p924_p5 = pneg %p1255_p0 }
  0x47   : > { %s927_s9 = scalar_lea.hbm %s1531_s0, 8192  ;;  %p928_p1 = scmp.lt.u32.totalorder %s1262_s11, %s1531_s0 }
  0x48   : > { %p925_p7 = pnand %p924_p5, %p923_p3  ;;  %p929_p2 = scmp.lt.u32.totalorder %s927_s9, %s922_s8 }
  0x49   : > { %p931_p6 = scmp.lt.u32.totalorder %s922_s8, %s1262_s11 }
  0x4a   : > { %p926_p9 = pneg %p925_p7  ;;  %p930_p4 = por %p929_p2, %p928_p1 }
  0x4c   : > { %p932_p8 = por %p931_p6, %p930_p4 }
  0x4e   : > { %p933_p10 = pnand %p932_p8, %p926_p9 }
  0x50   : > { %936 = shalt.err (!%p933_p10)
}
  0x51   : > { %s937_s12 = scalar_lea.vmem %s1249_s7, 2048  ;;  %s1091_s14 = smov [#allocation2]  }
  0x52   : > { %p938_p12 = scmp.ne.s32.totalorder %s1249_s7, %s937_s12  ;;  %s942_s23 = sshll.u32 %s1091_s14, 4  ;;  %s943_s23 = int_to_ptr.vmem [resolvable:$false] %s942_s23 }
  0x53   : > { %s944_s24 = scalar_lea.vmem %s943_s23, 4096  ;;  %p945_p7 = scmp.lt.s32.totalorder %s1249_s7, %s943_s23 }
  0x54   : > { %p940_p13 = pnand %p938_p12, %p924_p5  ;;  %p946_p1 = scmp.lt.s32.totalorder %s944_s24, %s937_s12 }
  0x56   : > { %p941_p3 = pneg %p940_p13  ;;  %p947_p2 = por %p946_p1, %p945_p7 }
  0x58   : > { %p948_p4 = pnand %p947_p2, %p941_p3 }
  0x5a   : > { %951 = shalt.err (!%p948_p4)
}
  0x5b   : > { %s1092_s26 = smov 128   ;;  %s1093_s30 = smov 8  }
  0x5c   : > { %809 = dma.hbm_to_vmem [thread:$0]  (!%p1255_p0), %s1262_s11, 2048, %s1249_s7, %s1264_s10, %s1092_s26, %s1092_s26, %s1093_s30  }
  0x5d   : > { %p1562_p5 = scmp.ne.s32.totalorder %s1553_s29, 0 }
  0x5e   : > { %s1295_s8 = sand.u32 (!%p1562_p5), 1, %s1062_s16   ;;  %p1563_p9 = scmp.ne.s32.totalorder (!%p1562_p5), %s1550_s27, 0 }
  0x5f   : > { %222 = sbr.rel (%p1562_p5) target bundleno = 559 (0x22f), region = 32  ;;  %s1298_s5 = sshll.u32 (!%p1562_p5), %s1295_s8, 7 }
  0x60   : > { %s225_s20 = scalar_lea.sflag (!%p1562_p5), [#allocation3], %s1295_s8  ;;  %s1302_s9 = scalar_lea.vmem (!%p1562_p5), [#allocation2], %s1298_s5 }
  0x66   : > { %1041 = dma.done.wait (%p1563_p9), %s225_s20, 2048  }
  0x67   : > { %1043 = vsyncadd (%p1563_p9), %s225_s20, 4294965248  ;;  %p1564_p0 = scmp.ne.s32.totalorder %s1548_s25, 0 }
  0x69   : > { %1045 = dma.done.wait (%p1564_p0), [#allocation6], 4096  }
  0x6a   : > { %1047 = vsyncadd (%p1564_p0), [#allocation6], 4294963200  ;;  %v1094_v0 = vmov 0.0   ;;  %v281_v1 = vld [vmem:[#allocation5 + $0x8] sm:$0xff]  ;;  %v283_v2 = vld [vmem:[#allocation5 + $0x18] sm:$0xff]  ;;  %s1357_s27 = scalar_lea.vmem [#allocation8], %s1298_s5 }
  0x6b   : > { %388 = vmatprep.mubr.f32.mxu0 %v1094_v0  ;;  %436 = vmatprep.mubr.f32.mxu1 %v1094_v0  ;;  %v280_v3 = vld [vmem:[#allocation5] sm:$0xff]  ;;  %v744_v4 = vpack.c.bf16 %v283_v2, %v281_v1  ;;  %v282_v5 = vld [vmem:[#allocation5 + $0x10] sm:$0xff]  ;;  %v285_v6 = vld [vmem:[#allocation5 + $0x28] sm:$0xff]  ;;  %v314_v2 = vlaneseq  ;;  %s737_s29 = sshll.u32 %s1074_s19, 5  ;;  %s739_s7 = sshll.u32 %s1070_s18, 4 }
  0x6c   : > { %v287_v7 = vld [vmem:[#allocation5 + $0x38] sm:$0xff]  ;;  %v746_v8 = vpack.c.bf16 %v282_v5, %v280_v3  ;;  %v284_v10 = vld [vmem:[#allocation5 + $0x20] sm:$0xff]  ;;  %v286_v11 = vld [vmem:[#allocation5 + $0x30] sm:$0xff]  ;;  %s584_s11 = sadd.s32 %s739_s7, %s737_s29  ;;  %s587_s14 = sshll.u32 %s1357_s27, 4  ;;  %s1418_s14 = int_to_ptr.vmem [resolvable:$true] %s587_s14 }
  0x6d   : > { %v748_v9 = vpack.c.bf16 %v287_v7, %v285_v6  ;;  %v289_v12 = vld [vmem:[#allocation5 + $0x48] sm:$0xff]  ;;  %745 = vmatprep.subr.bf16.mxu0 %v744_v4  ;;  %v291_v13 = vld [vmem:[#allocation5 + $0x58] sm:$0xff]  ;;  %776 = vmatprep.subr.bf16.mxu1 %v744_v4  ;;  %v750_v14 = vpack.c.bf16 %v286_v11, %v284_v10  ;;  %v288_v16 = vld [vmem:[#allocation5 + $0x40] sm:$0xff]  ;;  %v315_v3 = vshrl.u32 %v314_v2, 7  ;;  %s741_s10 = sshll.u32 %s584_s11, 7  ;;  %s555_s23 = scalar_lea.sflag [#allocation9], %s1295_s8 }
  0x6e   : > { %747 = vmatpush1.bf16.msra.mxu0 %v746_v8  ;;  %784 = vmatpush1.bf16.msra.mxu1 %v746_v8  ;;  %v752_v15 = vpack.c.bf16 %v291_v13, %v289_v12  ;;  %v290_v17 = vld [vmem:[#allocation5 + $0x50] sm:$0xff]  ;;  %v293_v18 = vld [vmem:[#allocation5 + $0x68] sm:$0xff]  ;;  %v295_v19 = vld [vmem:[#allocation5 + $0x78] sm:$0xff]  ;;  %s1415_s12 = scalar_lea.hbm %s1535_s4, %s741_s10  ;;  %s952_s24 = scalar_lea.vmem %s1418_s14, 2048 }
  0x6f   : > { %749 = vmatprep.subr.bf16.mxu0 %v748_v9  ;;  %777 = vmatprep.subr.bf16.mxu1 %v748_v9  ;;  %v754_v20 = vpack.c.bf16 %v290_v17, %v288_v16  ;;  %v756_v21 = vpack.c.bf16 %v295_v19, %v293_v18  ;;  %v292_v22 = vld [vmem:[#allocation5 + $0x60] sm:$0xff]  ;;  %v294_v23 = vld [vmem:[#allocation5 + $0x70] sm:$0xff]  ;;  %v297_v24 = vld [vmem:[#allocation5 + $0x88] sm:$0xff]  ;;  %v316_v4 = vsub.s32 0, %v315_v3  ;;  %v320_v6 = vsub.s32 1, %v315_v3  ;;  %p953_p6 = scmp.ne.s32.totalorder %s1418_s14, %s952_s24  ;;  %s1095_s26 = smov [#allocation8]  }
  0x70   : > { %v299_v25 = vld [vmem:[#allocation5 + $0x98] sm:$0xff]  ;;  %v758_v26 = vpack.c.bf16 %v294_v23, %v292_v22  ;;  %v296_v28 = vld [vmem:[#allocation5 + $0x80] sm:$0xff]  ;;  %v298_v29 = vld [vmem:[#allocation5 + $0x90] sm:$0xff]  ;;  %s956_s30 = sshll.u32 %s1095_s26, 4  ;;  %s957_s30 = int_to_ptr.vmem [resolvable:$false] %s956_s30 }
  0x71   : > { %v760_v27 = vpack.c.bf16 %v299_v25, %v297_v24  ;;  %v301_v30 = vld [vmem:[#allocation5 + $0xa8] sm:$0xff]  ;;  %v303_v31 = vld [vmem:[#allocation5 + $0xb8] sm:$0xff]  ;;  %v762_v32 = vpack.c.bf16 %v298_v29, %v296_v28  ;;  %v300_v34 = vld [vmem:[#allocation5 + $0xa0] sm:$0xff]  ;;  %p954_p8 = pnand %p953_p6, %p1230_p11  ;;  %s958_s20 = scalar_lea.vmem %s957_s30, 4096 }
  0x72   : > { %751 = vmatpush1.bf16.msra.mxu0 %v750_v14  ;;  %785 = vmatpush1.bf16.msra.mxu1 %v750_v14  ;;  %v764_v33 = vpack.c.bf16 %v303_v31, %v301_v30  ;;  %v302_v35 = vld [vmem:[#allocation5 + $0xb0] sm:$0xff]  ;;  %v305_v36 = vld [vmem:[#allocation5 + $0xc8] sm:$0xff]  ;;  %v307_v37 = vld [vmem:[#allocation5 + $0xd8] sm:$0xff]  ;;  %p959_p12 = scmp.lt.s32.totalorder %s1418_s14, %s957_s30  ;;  %p960_p13 = scmp.lt.s32.totalorder %s958_s20, %s952_s24 }
  0x73   : > { %753 = vmatprep.subr.bf16.mxu0 %v752_v15  ;;  %778 = vmatprep.subr.bf16.mxu1 %v752_v15  ;;  %v766_v38 = vpack.c.bf16 %v302_v35, %v300_v34  ;;  %v768_v39 = vpack.c.bf16 %v307_v37, %v305_v36  ;;  %v304_v40 = vld [vmem:[#allocation5 + $0xc0] sm:$0xff]  ;;  %v306_v41 = vld [vmem:[#allocation5 + $0xd0] sm:$0xff]  ;;  %v309_v42 = vld [vmem:[#allocation5 + $0xe8] sm:$0xff]  ;;  %p955_p10 = pneg %p954_p8 }
  0x74   : > { %v311_v43 = vld [vmem:[#allocation5 + $0xf8] sm:$0xff]  ;;  %v770_v44 = vpack.c.bf16 %v306_v41, %v304_v40  ;;  %v308_v46 = vld [vmem:[#allocation5 + $0xe0] sm:$0xff]  ;;  %v310_v47 = vld [vmem:[#allocation5 + $0xf0] sm:$0xff]  ;;  %p961_p3 = por %p960_p13, %p959_p12 }
  0x75   : > { %v772_v45 = vpack.c.bf16 %v311_v43, %v309_v42  ;;  %v774_v48 = vpack.c.bf16 %v310_v47, %v308_v46  ;;  %v264_v49 = vld [vmem:[%s1302_s9] sm:$0xff]  ;;  %v265_v51 = vld [vmem:[%s1302_s9 + $0x8] sm:$0xff]  ;;  %v266_v53 = vld [vmem:[%s1302_s9 + $0x10] sm:$0xff] }
  0x76   : > { %755 = vmatpush1.bf16.msra.mxu0 %v754_v20  ;;  %786 = vmatpush1.bf16.msra.mxu1 %v754_v20  ;;  %v272_v50 = vld [vmem:[%s1302_s9 + $0x40] sm:$0xff]  ;;  %v273_v52 = vld [vmem:[%s1302_s9 + $0x48] sm:$0xff]  ;;  %v274_v54 = vld [vmem:[%s1302_s9 + $0x50] sm:$0xff]  ;;  %p962_p7 = pnand %p961_p3, %p955_p10 }
  0x77   : > { %757 = vmatprep.subr.bf16.mxu0 %v756_v21  ;;  %779 = vmatprep.subr.bf16.mxu1 %v756_v21  ;;  %v267_v55 = vld [vmem:[%s1302_s9 + $0x18] sm:$0xff]  ;;  %v268_v57 = vld [vmem:[%s1302_s9 + $0x20] sm:$0xff]  ;;  %v269_v59 = vld [vmem:[%s1302_s9 + $0x28] sm:$0xff] }
  0x78   : > { %v275_v56 = vld [vmem:[%s1302_s9 + $0x58] sm:$0xff]  ;;  %v276_v58 = vld [vmem:[%s1302_s9 + $0x60] sm:$0xff]  ;;  %v277_v60 = vld [vmem:[%s1302_s9 + $0x68] sm:$0xff] }
  0x79   : > { %v270_v61 = vld [vmem:[%s1302_s9 + $0x30] sm:$0xff]  ;;  %v271_v63 = vld [vmem:[%s1302_s9 + $0x38] sm:$0xff]  ;;  %v312_v5 = vld [vmem:[%s1533_s2] sm:$0x3] }
  0x7a   : > { %759 = vmatpush1.bf16.msra.mxu0 %v758_v26  ;;  %787 = vmatpush1.bf16.msra.mxu1 %v758_v26  ;;  %v278_v62 = vld [vmem:[%s1302_s9 + $0x70] sm:$0xff]  ;;  %v279_v1 = vld [vmem:[%s1302_s9 + $0x78] sm:$0xff]  ;;  %v1347_v7 = vrot.slane %v312_v5, %v316_v4  ;;  %v1349_v8 = vrot.slane %v312_v5, %v320_v6 }
  0x7b   : > { %761 = vmatprep.subr.bf16.mxu0 %v760_v27  ;;  %780 = vmatprep.subr.bf16.mxu1 %v760_v27 }
  0x7e   : > { %763 = vmatpush1.bf16.msra.mxu0 %v762_v32  ;;  %788 = vmatpush1.bf16.msra.mxu1 %v762_v32 }
  0x7f   : > { %765 = vmatprep.subr.bf16.mxu0 %v764_v33  ;;  %781 = vmatprep.subr.bf16.mxu1 %v764_v33 }
  0x82   : > { %767 = vmatpush1.bf16.msra.mxu0 %v766_v38  ;;  %789 = vmatpush1.bf16.msra.mxu1 %v766_v38 }
  0x83   : > { %769 = vmatprep.subr.bf16.mxu0 %v768_v39  ;;  %782 = vmatprep.subr.bf16.mxu1 %v768_v39 }
  0x86   : > { %771 = vmatpush1.bf16.msra.mxu0 %v770_v44  ;;  %790 = vmatpush1.bf16.msra.mxu1 %v770_v44 }
  0x87   : > { %773 = vmatprep.subr.bf16.mxu0 %v772_v45  ;;  %783 = vmatprep.subr.bf16.mxu1 %v772_v45 }
  0x8a   : > { %775 = vmatpush1.bf16.msra.mxu0 %v774_v48  ;;  %791 = vmatpush1.bf16.msra.mxu1 %v774_v48 }
  0x8d   : > { %389 = vmatmul.mubr.f32.vlgmr.msra.gmra.mrb[0].mxu0 %v264_v49  ;;  %437 = vmatmul.mubr.f32.vlgmr.msra.gmra.mrb[0].mxu1 %v272_v50 }
  0x8e   : > { %394 = vmatprep.mubr.f32.mxu0 %v1094_v0  ;;  %442 = vmatprep.mubr.f32.mxu1 %v1094_v0 }
  0x91   : > { %395 = vmatmul.mubr.f32.gmra.mrb[2].mxu0 %v265_v51  ;;  %443 = vmatmul.mubr.f32.gmra.mrb[2].mxu1 %v273_v52 }
  0x92   : > { %400 = vmatprep.mubr.f32.mxu0 %v1094_v0  ;;  %448 = vmatprep.mubr.f32.mxu1 %v1094_v0 }
  0x95   : > { %401 = vmatmul.mubr.f32.gmra.mrb[4].mxu0 %v266_v53  ;;  %449 = vmatmul.mubr.f32.gmra.mrb[4].mxu1 %v274_v54 }
  0x96   : > { %406 = vmatprep.mubr.f32.mxu0 %v1094_v0  ;;  %454 = vmatprep.mubr.f32.mxu1 %v1094_v0 }
  0x99   : > { %407 = vmatmul.mubr.f32.gmra.mrb[6].mxu0 %v267_v55  ;;  %455 = vmatmul.mubr.f32.gmra.mrb[6].mxu1 %v275_v56 }
  0x9a   : > { %412 = vmatprep.mubr.f32.mxu0 %v1094_v0  ;;  %460 = vmatprep.mubr.f32.mxu1 %v1094_v0 }
  0x9d   : > { %413 = vmatmul.mubr.f32.gmra.mrb[8].mxu0 %v268_v57  ;;  %461 = vmatmul.mubr.f32.gmra.mrb[8].mxu1 %v276_v58 }
  0x9e   : > { %418 = vmatprep.mubr.f32.mxu0 %v1094_v0  ;;  %466 = vmatprep.mubr.f32.mxu1 %v1094_v0 }
  0xa1   : > { %419 = vmatmul.mubr.f32.gmra.mrb[10].mxu0 %v269_v59  ;;  %467 = vmatmul.mubr.f32.gmra.mrb[10].mxu1 %v277_v60 }
  0xa2   : > { %424 = vmatprep.mubr.f32.mxu0 %v1094_v0  ;;  %472 = vmatprep.mubr.f32.mxu1 %v1094_v0 }
  0xa5   : > { %425 = vmatmul.mubr.f32.gmra.mrb[12].mxu0 %v270_v61  ;;  %473 = vmatmul.mubr.f32.gmra.mrb[12].mxu1 %v278_v62 }
  0xa6   : > { %430 = vmatprep.mubr.f32.mxu0 %v1094_v0  ;;  %478 = vmatprep.mubr.f32.mxu1 %v1094_v0 }
  0xa9   : > { %431 = vmatmul.mubr.f32.gmra.mrb[14].mxu0 %v271_v63  ;;  %479 = vmatmul.mubr.f32.gmra.mrb[14].mxu1 %v279_v1 }
 0x160   : > { %v390_v9 = vpop.f32.mrb[0].mxu0  ;;  %v1351_v10 = vpop.f32.mrb[0].mxu1 }
 0x161   : > { %v392_v0 = vpop.f32.mrb[1].mxu0  ;;  %v391_v11 = vadd.f32 %v390_v9, %v1347_v7  ;;  %v440_v12 = vpop.f32.mrb[1].mxu1  ;;  %v439_v1 = vadd.f32 %v1351_v10, %v1347_v7 }
 0x162   : > { %v393_v13 = vadd.f32 %v392_v0, %v1349_v8  ;;  %v441_v14 = vadd.f32 %v440_v12, %v1349_v8 }
 0x163   : > { %485 = vxpose.xlu0.b32.start [1/16] %v391_v11, 128 }
 0x164   : > { %533 = vst [vmem:[%s1357_s27] sm:$0xff] %v393_v13  ;;  %v396_v15 = vpop.f32.mrb[2].mxu0  ;;  %541 = vst [vmem:[%s1357_s27 + $0x40] sm:$0xff] %v441_v14  ;;  %v1361_v16 = vpop.f32.mrb[2].mxu1 }
 0x165   : > { %v397_v17 = vadd.f32 %v396_v15, %v1347_v7  ;;  %v398_v18 = vpop.f32.mrb[3].mxu0  ;;  %v446_v19 = vpop.f32.mrb[3].mxu1  ;;  %v445_v2 = vadd.f32 %v1361_v16, %v1347_v7 }
 0x166   : > { %v399_v20 = vadd.f32 %v398_v18, %v1349_v8  ;;  %v447_v21 = vadd.f32 %v446_v19, %v1349_v8 }
 0x167   : > { %486 = vxpose.xlu0.b32.cont [2/16] %v397_v17, 128 }
 0x168   : > { %534 = vst [vmem:[%s1357_s27 + $0x8] sm:$0xff] %v399_v20  ;;  %v402_v22 = vpop.f32.mrb[4].mxu0  ;;  %542 = vst [vmem:[%s1357_s27 + $0x48] sm:$0xff] %v447_v21  ;;  %v450_v23 = vpop.f32.mrb[4].mxu1 }
 0x169   : > { %v403_v24 = vadd.f32 %v402_v22, %v1347_v7  ;;  %v404_v25 = vpop.f32.mrb[5].mxu0  ;;  %v452_v26 = vpop.f32.mrb[5].mxu1  ;;  %v451_v3 = vadd.f32 %v450_v23, %v1347_v7 }
 0x16a   : > { %v405_v27 = vadd.f32 %v404_v25, %v1349_v8  ;;  %v453_v28 = vadd.f32 %v452_v26, %v1349_v8 }
 0x16b   : > { %487 = vxpose.xlu0.b32.cont [3/16] %v403_v24, 128 }
 0x16c   : > { %535 = vst [vmem:[%s1357_s27 + $0x10] sm:$0xff] %v405_v27  ;;  %v408_v29 = vpop.f32.mrb[6].mxu0  ;;  %543 = vst [vmem:[%s1357_s27 + $0x50] sm:$0xff] %v453_v28  ;;  %v456_v30 = vpop.f32.mrb[6].mxu1 }
 0x16d   : > { %v409_v31 = vadd.f32 %v408_v29, %v1347_v7  ;;  %v410_v32 = vpop.f32.mrb[7].mxu0  ;;  %v458_v33 = vpop.f32.mrb[7].mxu1  ;;  %v457_v4 = vadd.f32 %v456_v30, %v1347_v7 }
 0x16e   : > { %v411_v34 = vadd.f32 %v410_v32, %v1349_v8  ;;  %v459_v35 = vadd.f32 %v458_v33, %v1349_v8 }
 0x16f   : > { %488 = vxpose.xlu0.b32.cont [4/16] %v409_v31, 128 }
 0x170   : > { %536 = vst [vmem:[%s1357_s27 + $0x18] sm:$0xff] %v411_v34  ;;  %v414_v36 = vpop.f32.mrb[8].mxu0  ;;  %544 = vst [vmem:[%s1357_s27 + $0x58] sm:$0xff] %v459_v35  ;;  %v462_v37 = vpop.f32.mrb[8].mxu1 }
 0x171   : > { %v415_v38 = vadd.f32 %v414_v36, %v1347_v7  ;;  %v416_v39 = vpop.f32.mrb[9].mxu0  ;;  %v464_v40 = vpop.f32.mrb[9].mxu1  ;;  %v463_v5 = vadd.f32 %v462_v37, %v1347_v7 }
 0x172   : > { %v417_v41 = vadd.f32 %v416_v39, %v1349_v8  ;;  %v465_v42 = vadd.f32 %v464_v40, %v1349_v8 }
 0x173   : > { %489 = vxpose.xlu0.b32.cont [5/16] %v415_v38, 128 }
 0x174   : > { %537 = vst [vmem:[%s1357_s27 + $0x20] sm:$0xff] %v417_v41  ;;  %v420_v43 = vpop.f32.mrb[10].mxu0  ;;  %545 = vst [vmem:[%s1357_s27 + $0x60] sm:$0xff] %v465_v42  ;;  %v468_v44 = vpop.f32.mrb[10].mxu1 }
 0x175   : > { %v421_v45 = vadd.f32 %v420_v43, %v1347_v7  ;;  %v422_v46 = vpop.f32.mrb[11].mxu0  ;;  %v470_v47 = vpop.f32.mrb[11].mxu1  ;;  %v469_v6 = vadd.f32 %v468_v44, %v1347_v7 }
 0x176   : > { %v423_v48 = vadd.f32 %v422_v46, %v1349_v8  ;;  %v471_v49 = vadd.f32 %v470_v47, %v1349_v8 }
 0x177   : > { %490 = vxpose.xlu0.b32.cont [6/16] %v421_v45, 128 }
 0x178   : > { %538 = vst [vmem:[%s1357_s27 + $0x28] sm:$0xff] %v423_v48  ;;  %v426_v50 = vpop.f32.mrb[12].mxu0  ;;  %546 = vst [vmem:[%s1357_s27 + $0x68] sm:$0xff] %v471_v49  ;;  %v474_v51 = vpop.f32.mrb[12].mxu1 }
 0x179   : > { %v427_v52 = vadd.f32 %v426_v50, %v1347_v7  ;;  %v428_v53 = vpop.f32.mrb[13].mxu0  ;;  %v476_v54 = vpop.f32.mrb[13].mxu1 }
 0x17a   : > { %v429_v55 = vadd.f32 %v428_v53, %v1349_v8  ;;  %v477_v56 = vadd.f32 %v476_v54, %v1349_v8 }
 0x17b   : > { %491 = vxpose.xlu0.b32.cont [7/16] %v427_v52, 128 }
 0x17c   : > { %539 = vst [vmem:[%s1357_s27 + $0x30] sm:$0xff] %v429_v55  ;;  %v432_v57 = vpop.f32.mrb[14].mxu0  ;;  %547 = vst [vmem:[%s1357_s27 + $0x70] sm:$0xff] %v477_v56  ;;  %v480_v58 = vpop.f32.mrb[14].mxu1 }
 0x17d   : > { %v433_v59 = vadd.f32 %v432_v57, %v1347_v7  ;;  %v434_v60 = vpop.f32.mrb[15].mxu0  ;;  %v482_v61 = vpop.f32.mrb[15].mxu1  ;;  %v481_v9 = vadd.f32 %v480_v58, %v1347_v7 }
 0x17e   : > { %v435_v62 = vadd.f32 %v434_v60, %v1349_v8  ;;  %v483_v63 = vadd.f32 %v482_v61, %v1349_v8  ;;  %v475_v8 = vadd.f32 %v474_v51, %v1347_v7 }
 0x17f   : > { %492 = vxpose.xlu0.b32.cont [8/16] %v433_v59, 128 }
 0x180   : > { %540 = vst [vmem:[%s1357_s27 + $0x38] sm:$0xff] %v435_v62  ;;  %548 = vst [vmem:[%s1357_s27 + $0x78] sm:$0xff] %v483_v63 }
 0x183   : > { %493 = vxpose.xlu0.b32.cont [9/16] %v439_v1, 128 }
 0x187   : > { %494 = vxpose.xlu0.b32.cont [10/16] %v445_v2, 128 }
 0x18b   : > { %495 = vxpose.xlu0.b32.cont [11/16] %v451_v3, 128 }
 0x18f   : > { %496 = vxpose.xlu0.b32.cont [12/16] %v457_v4, 128 }
 0x193   : > { %497 = vxpose.xlu0.b32.cont [13/16] %v463_v5, 128 }
 0x197   : > { %498 = vxpose.xlu0.b32.cont [14/16] %v469_v6, 128 }
 0x19b   : > { %499 = vxpose.xlu0.b32.cont [15/16] %v475_v8, 128 }
 0x19f   : > { %500 = vxpose.xlu0.b32.end [16/16] %v481_v9, 128 }
 0x1a0   : > { %965 = shalt.err (!%p962_p7)
}
 0x1a1   : > { %s966_s9 = scalar_lea.hbm %s1415_s12, 2048  ;;  %s970_s27 = scalar_lea.hbm %s1535_s4, 8192 }
 0x1a2   : > { %p967_p1 = scmp.ne.s32.totalorder %s1415_s12, %s966_s9  ;;  %p971_p5 = scmp.lt.u32.totalorder %s1415_s12, %s1535_s4 }
 0x1a3   : > { %p972_p9 = scmp.lt.u32.totalorder %s970_s27, %s966_s9  ;;  %p974_p6 = scmp.lt.u32.totalorder %s966_s9, %s1415_s12 }
 0x1a4   : > { %p968_p2 = pnand %p967_p1, %p1230_p11 }
 0x1a5   : > { %p973_p0 = por %p972_p9, %p971_p5 }
 0x1a6   : > { %p969_p4 = pneg %p968_p2 }
 0x1a7   : > { %p975_p8 = por %p974_p6, %p973_p0 }
 0x1a9   : > { %p976_p10 = pnand %p975_p8, %p969_p4 }
 0x1ab   : > { %979 = shalt.err (!%p976_p10)
}
 0x1ac   : > { %s1096_s10 = smov 128   ;;  %s1097_s28 = smov 8  }
 0x1ad   : > { %799 = dma.vmem_to_hbm [thread:$0]  (%p1230_p11), %s1418_s14, 2048, %s1415_s12, %s555_s23, %s1096_s10, %s1096_s10, %s1097_s28  }
 0x1ae   : > { %s1448_s13 = scalar_lea.vmem [#allocation7], %s1298_s5  ;;  %s566_s5 = sadd.s32 %s1070_s18, %s737_s29 }
 0x1af   : > { %s738_s12 = sshll.u32 %s566_s5, 7  ;;  %s569_s14 = sshll.u32 %s1448_s13, 4  ;;  %s1474_s14 = int_to_ptr.vmem [resolvable:$true] %s569_s14 }
 0x1b0   : > { %s1472_s26 = scalar_lea.hbm %s1534_s3, %s738_s12  ;;  %s550_s30 = scalar_lea.sflag [#allocation4], %s1295_s8 }
 0x1b1   : > { %s980_s19 = scalar_lea.vmem %s1474_s14, 2048  ;;  %s1098_s18 = smov [#allocation7]  }
 0x1b2   : > { %p981_p12 = scmp.ne.s32.totalorder %s1474_s14, %s980_s19  ;;  %s984_s29 = sshll.u32 %s1098_s18, 4  ;;  %s985_s29 = int_to_ptr.vmem [resolvable:$false] %s984_s29 }
 0x1b3   : > { %s986_s20 = scalar_lea.vmem %s985_s29, 4096  ;;  %p987_p7 = scmp.lt.s32.totalorder %s1474_s14, %s985_s29 }
 0x1b4   : > { %p982_p13 = pnand %p981_p12, %p1230_p11  ;;  %p988_p1 = scmp.lt.s32.totalorder %s986_s20, %s980_s19 }
 0x1b6   : > { %p983_p3 = pneg %p982_p13  ;;  %p989_p2 = por %p988_p1, %p987_p7 }
 0x1b8   : > { %p990_p4 = pnand %p989_p2, %p983_p3 }
 0x1e3   : > { %v501_v7 = vpop.trf.xlu0 }
 0x1e4   : > { %517 = vst [vmem:[%s1448_s13] sm:$0xff] %v501_v7 }
 0x1e7   : > { %v502_v10 = vpop.trf.xlu0 }
 0x1e8   : > { %518 = vst [vmem:[%s1448_s13 + $0x8] sm:$0xff] %v502_v10 }
 0x1eb   : > { %v503_v0 = vpop.trf.xlu0 }
 0x1ec   : > { %519 = vst [vmem:[%s1448_s13 + $0x10] sm:$0xff] %v503_v0 }
 0x1ef   : > { %v504_v11 = vpop.trf.xlu0 }
 0x1f0   : > { %520 = vst [vmem:[%s1448_s13 + $0x18] sm:$0xff] %v504_v11 }
 0x1f3   : > { %v505_v12 = vpop.trf.xlu0 }
 0x1f4   : > { %521 = vst [vmem:[%s1448_s13 + $0x20] sm:$0xff] %v505_v12 }
 0x1f7   : > { %v506_v13 = vpop.trf.xlu0 }
 0x1f8   : > { %522 = vst [vmem:[%s1448_s13 + $0x28] sm:$0xff] %v506_v13 }
 0x1fb   : > { %v507_v14 = vpop.trf.xlu0 }
 0x1fc   : > { %523 = vst [vmem:[%s1448_s13 + $0x30] sm:$0xff] %v507_v14 }
 0x1ff   : > { %v508_v15 = vpop.trf.xlu0 }
 0x200   : > { %524 = vst [vmem:[%s1448_s13 + $0x38] sm:$0xff] %v508_v15 }
 0x203   : > { %v509_v16 = vpop.trf.xlu0 }
 0x204   : > { %525 = vst [vmem:[%s1448_s13 + $0x40] sm:$0xff] %v509_v16 }
 0x207   : > { %v510_v17 = vpop.trf.xlu0 }
 0x208   : > { %526 = vst [vmem:[%s1448_s13 + $0x48] sm:$0xff] %v510_v17 }
 0x20b   : > { %v511_v18 = vpop.trf.xlu0 }
 0x20c   : > { %527 = vst [vmem:[%s1448_s13 + $0x50] sm:$0xff] %v511_v18 }
 0x20f   : > { %v512_v19 = vpop.trf.xlu0 }
 0x210   : > { %528 = vst [vmem:[%s1448_s13 + $0x58] sm:$0xff] %v512_v19 }
 0x213   : > { %v513_v20 = vpop.trf.xlu0 }
 0x214   : > { %529 = vst [vmem:[%s1448_s13 + $0x60] sm:$0xff] %v513_v20 }
 0x217   : > { %v514_v21 = vpop.trf.xlu0 }
 0x218   : > { %530 = vst [vmem:[%s1448_s13 + $0x68] sm:$0xff] %v514_v21 }
 0x21b   : > { %v515_v22 = vpop.trf.xlu0 }
 0x21c   : > { %531 = vst [vmem:[%s1448_s13 + $0x70] sm:$0xff] %v515_v22 }
 0x21f   : > { %v516_v23 = vpop.trf.xlu0 }
 0x220   : > { %532 = vst [vmem:[%s1448_s13 + $0x78] sm:$0xff] %v516_v23 }
 0x221   : > { %993 = shalt.err (!%p990_p4)
}
 0x222   : > { %s994_s9 = scalar_lea.hbm %s1472_s26, 2048  ;;  %s998_s27 = scalar_lea.hbm %s1534_s3, 8192 }
 0x223   : > { %p995_p5 = scmp.ne.s32.totalorder %s1472_s26, %s994_s9  ;;  %p999_p6 = scmp.lt.u32.totalorder %s1472_s26, %s1534_s3 }
 0x224   : > { %p1000_p8 = scmp.lt.u32.totalorder %s998_s27, %s994_s9  ;;  %p1002_p12 = scmp.lt.u32.totalorder %s994_s9, %s1472_s26 }
 0x225   : > { %p996_p9 = pnand %p995_p5, %p1230_p11 }
 0x226   : > { %p1001_p10 = por %p1000_p8, %p999_p6 }
 0x227   : > { %p997_p0 = pneg %p996_p9 }
 0x228   : > { %p1003_p13 = por %p1002_p12, %p1001_p10 }
 0x22a   : > { %p1004_p3 = pnand %p1003_p13, %p997_p0 }
 0x22c   : > { %1007 = shalt.err (!%p1004_p3)
}
 0x22d   : > { %s1099_s13 = smov 256  }
 0x22e   : > { %798 = dma.vmem_to_hbm [thread:$0]  (%p1230_p11), %s1474_s14, 2048, %s1472_s26, %s550_s30, %s1096_s10, %s1099_s13, %s1097_s28  }
 0x22f PF: > { %s1565_s5 = sld [smem:[#allocation14_spill]]  ;;  %s1566_s12 = sld [smem:[#allocation16_spill]] }
 0x230   : > { %p820_p7 = scmp.ge.s32.totalorder %s1086_s22, 2 }
 0x235   : > { %s602_s23 = sand.u32 1, %s1565_s5   ;;  %p1567_p1 = scmp.ne.s32.totalorder %s1566_s12, 0 }
 0x236   : > { %s603_s24 = scalar_lea.sflag [#allocation4], %s602_s23 }
 0x237   : > { %p811_p2 = pnand %p820_p7, %p1567_p1 }
 0x239   : > { %1049 = dma.done.wait (!%p811_p2), %s603_s24, 2048  }
 0x23a   : > { %1051 = vsyncadd (!%p811_p2), %s603_s24, 4294965248  ;;  %s612_s19 = scalar_lea.sflag [#allocation9], %s602_s23 }
 0x23b   : > { %1053 = dma.done.wait (!%p811_p2), %s612_s19, 2048  }
 0x23c   : > { %1055 = vsyncadd (!%p811_p2), %s612_s19, 4294965248  ;;  %s25_s22 = sadd.s32 1, %s1086_s22   ;;  %s1568_s18 = sld [smem:[#allocation15_spill]] }
 0x23d   : > { %p22_p4 = scmp.ge.s32.totalorder %s25_s22, 6   ;;  %s1569_s20 = sld [smem:[#allocation17_spill]] }
 0x23e   : > { %s1570_s6 = sld [smem:[#allocation18_spill]]  ;;  %s1571_s15 = smov %s1062_s16 }
 0x23f   : > { %s1572_s16 = smov %s1066_s17  ;;  %s1573_s17 = smov %s1247_s1 }
 0x240   : > { %s1574_s19 = smov %s1082_s21  ;;  %24 = sbr.rel (!%p22_p4) target bundleno = 12 (0xc), region = 98 }
 0x244   : > { %s1575_s21 = smov %s1570_s6 }
 0x247   :  { %617 = vsyncpa [#allocation3], 1 }
 0x248   :  { %619 = vsyncpa [#allocation3 + $0x1], 1 }
 0x249   :  { %620 = vsyncpa [#allocation6], 1 }
 0x24a   :  { %621 = vsyncpa [#allocation4], 1 }
 0x24b   :  { %623 = vsyncpa [#allocation4 + $0x1], 1 }
 0x24c   :  { %624 = vsyncpa [#allocation9], 1 }
 0x24d   :  { %626 = vsyncpa [#allocation9 + $0x1], 1 }

</bundles_post_ra>
